<compile_context>
chip_gen: v5e
topology: v5e:2x2
jax: 0.10.0
libtpu: 0.0.40
codegen_flags: <defaults>
</compile_context>

<pallas_src>
import functools

import jax
import jax.numpy as jnp
from jax.experimental import pallas as pl
from jax.experimental.pallas import tpu as pltpu


def _round_up(x, m):
    return ((x + m - 1) // m) * m


def _genevector_kernel(ii_ref, jj_ref, wi_t_ref, wj_t_ref, out_ref,
                       acc_i_ref, acc_j_ref):
    # ii_ref / jj_ref   : (1, TB) int32 index tiles (VMEM).
    # wi_t_ref/wj_t_ref : (D, Nc) transposed embedding-table chunks.
    # out_ref           : (1, TB) float32 output tile (batch on the lane axis).
    # acc_i/acc_j       : (D, TB) float32 accumulators (persist across k).
    k = pl.program_id(1)
    nk = pl.num_programs(1)
    nc = wi_t_ref.shape[1]
    tb = ii_ref.shape[1]

    @pl.when(k == 0)
    def _():
        acc_i_ref[...] = jnp.zeros_like(acc_i_ref)
        acc_j_ref[...] = jnp.zeros_like(acc_j_ref)

    # One-hot selection against *global* row ids for this vocab chunk.
    # Note: out-of-range indices (>= N) produce an all-zero one-hot and return
    # 0.0 instead of erroring like torch.nn.Embedding.
    base = k * nc
    row_ids = base + jax.lax.broadcasted_iota(jnp.int32, (nc, tb), 0)
    dt = wi_t_ref.dtype
    onehot_i = (row_ids == ii_ref[...]).astype(dt)   # (Nc, TB)
    onehot_j = (row_ids == jj_ref[...]).astype(dt)

    # MXU gather: (D, Nc) @ (Nc, TB) -> (D, TB), f32 accumulation.
    acc_i_ref[...] += jnp.dot(wi_t_ref[...], onehot_i,
                              preferred_element_type=jnp.float32)
    acc_j_ref[...] += jnp.dot(wj_t_ref[...], onehot_j,
                              preferred_element_type=jnp.float32)

    @pl.when(k == nk - 1)
    def _():
        # Per-pair dot product: reduce over D (sublane axis) -> (1, TB),
        # lane-dense unmasked store.
        out_ref[...] = jnp.sum(acc_i_ref[...] * acc_j_ref[...],
                               axis=0, keepdims=True)


@functools.partial(jax.jit,
                   static_argnames=("max_tile", "vocab_chunk", "table_dtype"))
def genevector_forward(wi_t, wj_t, i_indices, j_indices, *,
                       max_tile=1024, vocab_chunk=512,
                       table_dtype=jnp.bfloat16):
    """Forward pass.

    wi_t, wj_t : [D, N] pre-transposed embedding tables (transpose hoisted out
                 of the per-call path, per perf review).
    i_indices, j_indices : [B] integer gene indices.
    Returns [B] float32 per-pair dot products.
    """
    B = i_indices.shape[0]
    D, N = wi_t.shape

    # Lane-dense batch tiling: TB multiple of 128, Bp multiple of TB.
    max_tile = _round_up(max_tile, 128)
    TB = min(max_tile, _round_up(B, 128))
    Bp = _round_up(B, TB)
    pad_b = Bp - B

    # Vocabulary chunking: Nc multiple of 128, Np multiple of Nc.
    Np = _round_up(N, 128)
    Nc = min(_round_up(vocab_chunk, 128), Np)
    Np = _round_up(Np, Nc)
    pad_n = Np - N

    ii = jnp.pad(i_indices.astype(jnp.int32), (0, pad_b)).reshape(1, Bp)
    jj = jnp.pad(j_indices.astype(jnp.int32), (0, pad_b)).reshape(1, Bp)

    wi_t = wi_t.astype(table_dtype)
    wj_t = wj_t.astype(table_dtype)
    if pad_n:
        wi_t = jnp.pad(wi_t, ((0, 0), (0, pad_n)))
        wj_t = jnp.pad(wj_t, ((0, 0), (0, pad_n)))

    n_t = Bp // TB
    n_k = Np // Nc
    table_bytes = jnp.dtype(table_dtype).itemsize

    cost = pl.CostEstimate(
        flops=4 * D * Np * Bp + 2 * D * Bp,
        transcendentals=0,
        bytes_accessed=(n_t * 2 * D * Np * table_bytes   # table chunks per batch tile
                        + n_k * 2 * Bp * 4               # index tiles
                        + Bp * 4),                       # output
    )

    # VMEM working set (double-buffered inputs + scratch + in-kernel temps),
    # with headroom, instead of relying on the 16/32 MiB scoped defaults.
    vmem_bytes = (
        2 * (2 * D * Nc * table_bytes)        # wi_t / wj_t chunks, double-buffered
        + 2 * (2 * TB * 4)                    # ii / jj tiles, double-buffered
        + 2 * TB * 4                          # output tile
        + 2 * D * TB * 4                      # two f32 accumulators
        + Nc * TB * (4 + 2 * table_bytes)     # iota + two one-hot temporaries
    )
    vmem_limit = min(int(vmem_bytes * 1.5) + (2 << 20), 60 * 1024 * 1024)

    grid_spec = pltpu.PrefetchScalarGridSpec(
        num_scalar_prefetch=0,
        grid=(n_t, n_k),                               # reduction axis last
        in_specs=[
            pl.BlockSpec((1, TB), lambda t, k: (0, t)),    # i-index tile
            pl.BlockSpec((1, TB), lambda t, k: (0, t)),    # j-index tile
            pl.BlockSpec((D, Nc), lambda t, k: (0, k)),    # wi^T chunk
            pl.BlockSpec((D, Nc), lambda t, k: (0, k)),    # wj^T chunk
        ],
        out_specs=pl.BlockSpec((1, TB), lambda t, k: (0, t)),
        scratch_shapes=[
            pltpu.VMEM((D, TB), jnp.float32),   # acc_i
            pltpu.VMEM((D, TB), jnp.float32),   # acc_j
        ],
    )

    out = pl.pallas_call(
        _genevector_kernel,
        out_shape=jax.ShapeDtypeStruct((1, Bp), jnp.float32),
        grid_spec=grid_spec,
        compiler_params=pltpu.CompilerParams(
            dimension_semantics=("parallel", "arbitrary"),
            vmem_limit_bytes=vmem_limit,
        ),
        cost_estimate=cost,
    )(ii, jj, wi_t, wj_t)

    return out[0, :B]


def init_genevector_params(key, num_embeddings, embedding_dim, gain=1.0,
                           init_ortho=True):
    """Deterministic parameter init mirroring GeneVectorModel.__init__."""
    k_i, k_j = jax.random.split(key)
    if init_ortho:
        init_fn = jax.nn.initializers.orthogonal(scale=gain)
        wi = init_fn(k_i, (num_embeddings, embedding_dim), jnp.float32)
        wj = init_fn(k_j, (num_embeddings, embedding_dim), jnp.float32)
    else:
        wi = jax.random.uniform(k_i, (num_embeddings, embedding_dim),
                                jnp.float32, -1.0, 1.0)
        wj = jax.random.uniform(k_j, (num_embeddings, embedding_dim),
                                jnp.float32, -1.0, 1.0)
    return wi, wj


if __name__ == "__main__":
    num_embeddings = 32   # number of genes
    embedding_dim = 32    # latent dimension
    batch = 8             # gene-pair batch

    key = jax.random.PRNGKey(0)
    k_params, k_i, k_j = jax.random.split(key, 3)

    wi, wj = init_genevector_params(k_params, num_embeddings, embedding_dim,
                                    gain=1.0, init_ortho=True)
    i_indices = jax.random.randint(k_i, (batch,), 0, num_embeddings,
                                   dtype=jnp.int32)
    j_indices = jax.random.randint(k_j, (batch,), 0, num_embeddings,
                                   dtype=jnp.int32)

    # Table transpose hoisted out of the per-call wrapper (done once).
    wi_t = jnp.asarray(wi.T)   # (D, N)
    wj_t = jnp.asarray(wj.T)

    # Pure-JAX reference of the forward semantics.
    ref = jnp.sum(wi[i_indices] * wj[j_indices], axis=1)

    # Exact f32 gather path.
    out_f32 = genevector_forward(wi_t, wj_t, i_indices, j_indices,
                                 table_dtype=jnp.float32)
    out_f32 = jax.block_until_ready(out_f32)
    assert out_f32.shape == (batch,)
    assert jnp.allclose(out_f32, ref, atol=1e-5, rtol=1e-5), (out_f32, ref)

    # Default bf16 gather path (MXU-rate; only weight rounding differs).
    out_bf16 = genevector_forward(wi_t, wj_t, i_indices, j_indices,
                                  table_dtype=jnp.bfloat16)
    out_bf16 = jax.block_until_ready(out_bf16)
    assert out_bf16.shape == (batch,)
    assert jnp.allclose(out_bf16, ref, atol=5e-2, rtol=5e-2), (out_bf16, ref)

    print("KERNEL_OK")
</pallas_src>

<mosaic_0001>
module attributes {stable_mosaic.version = 11 : i64} {
  func.func @_genevector_kernel(%arg0: i32, %arg1: i32, %arg2: memref<1x128xi32, #tpu.memory_space<vmem>>, %arg3: memref<1x128xi32, #tpu.memory_space<vmem>>, %arg4: memref<32x128xf32, #tpu.memory_space<vmem>>, %arg5: memref<32x128xf32, #tpu.memory_space<vmem>>, %arg6: memref<1x128xf32, #tpu.memory_space<vmem>>, %arg7: memref<32x128xf32, #tpu.memory_space<vmem>>, %arg8: memref<32x128xf32, #tpu.memory_space<vmem>>) attributes {dimension_semantics = [#tpu.dimension_semantics<parallel>, #tpu.dimension_semantics<arbitrary>], iteration_bounds = array<i64: 1, 1>, scalar_prefetch = 0 : i64, scratch_operands = 2 : i64, tpu.core_type = #tpu.core_type<tc>, window_params = [{transform_indices = @transform_0, window_bounds = array<i64: 1, 128>}, {transform_indices = @transform_1, window_bounds = array<i64: 1, 128>}, {transform_indices = @transform_2, window_bounds = array<i64: 32, 128>}, {transform_indices = @transform_3, window_bounds = array<i64: 32, 128>}, {transform_indices = @transform_4, window_bounds = array<i64: 1, 128>}]} {
    %c0_i32 = arith.constant 0 : i32
    %0 = arith.cmpi eq, %arg1, %c0_i32 : i32
    %1 = arith.extui %0 : i1 to i32
    %c0_i32_0 = arith.constant 0 : i32
    %2 = arith.cmpi ne, %1, %c0_i32_0 : i32
    scf.if %2 {
      %cst_19 = arith.constant 0.000000e+00 : f32
      %30 = vector.broadcast %cst_19 : f32 to vector<32x128xf32>
      %c0_20 = arith.constant 0 : index
      %c0_21 = arith.constant 0 : index
      %31 = vector.load %arg7[%c0_20, %c0_21] : memref<32x128xf32, #tpu.memory_space<vmem>>, vector<32x128xf32>
      tpu.vector_store %arg7[%c0_20, %c0_21], %30 {strides = array<i32>} : memref<32x128xf32, #tpu.memory_space<vmem>>, vector<32x128xf32>,
      %cst_22 = arith.constant 0.000000e+00 : f32
      %32 = vector.broadcast %cst_22 : f32 to vector<32x128xf32>
      %c0_23 = arith.constant 0 : index
      %c0_24 = arith.constant 0 : index
      %33 = vector.load %arg8[%c0_23, %c0_24] : memref<32x128xf32, #tpu.memory_space<vmem>>, vector<32x128xf32>
      tpu.vector_store %arg8[%c0_23, %c0_24], %32 {strides = array<i32>} : memref<32x128xf32, #tpu.memory_space<vmem>>, vector<32x128xf32>,
    } else {
    }
    %c128_i32 = arith.constant 128 : i32
    %3 = arith.muli %arg1, %c128_i32 : i32
    %4 = tpu.iota {dimensions = array<i32: 0>} : vector<128x128xi32>
    %5 = vector.broadcast %3 : i32 to vector<128x128xi32>
    %6 = arith.addi %5, %4 : vector<128x128xi32>
    %c0 = arith.constant 0 : index
    %c0_1 = arith.constant 0 : index
    %7 = vector.load %arg2[%c0, %c0_1] : memref<1x128xi32, #tpu.memory_space<vmem>>, vector<1x128xi32>
    %8 = vector.broadcast %7 : vector<1x128xi32> to vector<128x128xi32>
    %9 = arith.cmpi eq, %6, %8 : vector<128x128xi32>
    %10 = arith.extui %9 : vector<128x128xi1> to vector<128x128xi32>
    %11 = arith.sitofp %10 : vector<128x128xi32> to vector<128x128xf32>
    %c0_2 = arith.constant 0 : index
    %c0_3 = arith.constant 0 : index
    %12 = vector.load %arg3[%c0_2, %c0_3] : memref<1x128xi32, #tpu.memory_space<vmem>>, vector<1x128xi32>
    %13 = vector.broadcast %12 : vector<1x128xi32> to vector<128x128xi32>
    %14 = arith.cmpi eq, %6, %13 : vector<128x128xi32>
    %15 = arith.extui %14 : vector<128x128xi1> to vector<128x128xi32>
    %16 = arith.sitofp %15 : vector<128x128xi32> to vector<128x128xf32>
    %c0_4 = arith.constant 0 : index
    %c0_5 = arith.constant 0 : index
    %17 = vector.load %arg7[%c0_4, %c0_5] : memref<32x128xf32, #tpu.memory_space<vmem>>, vector<32x128xf32>
    %c0_6 = arith.constant 0 : index
    %c0_7 = arith.constant 0 : index
    %18 = vector.load %arg4[%c0_6, %c0_7] : memref<32x128xf32, #tpu.memory_space<vmem>>, vector<32x128xf32>
    %cst = arith.constant dense<0.000000e+00> : vector<32x128xf32>
    %19 = tpu.matmul %18, %11, %cst {dimension_numbers = #tpu.dot_dimension_numbers<[1], [0], [0], [1], [0, 0, 1, 1], [], []>} : vector<32x128xf32>, vector<128x128xf32>, vector<32x128xf32> -> vector<32x128xf32>
    %20 = arith.addf %17, %19 : vector<32x128xf32>
    %c0_8 = arith.constant 0 : index
    %c0_9 = arith.constant 0 : index
    %21 = vector.load %arg7[%c0_8, %c0_9] : memref<32x128xf32, #tpu.memory_space<vmem>>, vector<32x128xf32>
    tpu.vector_store %arg7[%c0_8, %c0_9], %20 {strides = array<i32>} : memref<32x128xf32, #tpu.memory_space<vmem>>, vector<32x128xf32>,
    %c0_10 = arith.constant 0 : index
    %c0_11 = arith.constant 0 : index
    %22 = vector.load %arg8[%c0_10, %c0_11] : memref<32x128xf32, #tpu.memory_space<vmem>>, vector<32x128xf32>
    %c0_12 = arith.constant 0 : index
    %c0_13 = arith.constant 0 : index
    %23 = vector.load %arg5[%c0_12, %c0_13] : memref<32x128xf32, #tpu.memory_space<vmem>>, vector<32x128xf32>
    %cst_14 = arith.constant dense<0.000000e+00> : vector<32x128xf32>
    %24 = tpu.matmul %23, %16, %cst_14 {dimension_numbers = #tpu.dot_dimension_numbers<[1], [0], [0], [1], [0, 0, 1, 1], [], []>} : vector<32x128xf32>, vector<128x128xf32>, vector<32x128xf32> -> vector<32x128xf32>
    %25 = arith.addf %22, %24 : vector<32x128xf32>
    %c0_15 = arith.constant 0 : index
    %c0_16 = arith.constant 0 : index
    %26 = vector.load %arg8[%c0_15, %c0_16] : memref<32x128xf32, #tpu.memory_space<vmem>>, vector<32x128xf32>
    tpu.vector_store %arg8[%c0_15, %c0_16], %25 {strides = array<i32>} : memref<32x128xf32, #tpu.memory_space<vmem>>, vector<32x128xf32>,
    %c0_i32_17 = arith.constant 0 : i32
    %27 = arith.cmpi eq, %arg1, %c0_i32_17 : i32
    %28 = arith.extui %27 : i1 to i32
    %c0_i32_18 = arith.constant 0 : i32
    %29 = arith.cmpi ne, %28, %c0_i32_18 : i32
    scf.if %29 {
      %c0_19 = arith.constant 0 : index
      %c0_20 = arith.constant 0 : index
      %30 = vector.load %arg7[%c0_19, %c0_20] : memref<32x128xf32, #tpu.memory_space<vmem>>, vector<32x128xf32>
      %c0_21 = arith.constant 0 : index
      %c0_22 = arith.constant 0 : index
      %31 = vector.load %arg8[%c0_21, %c0_22] : memref<32x128xf32, #tpu.memory_space<vmem>>, vector<32x128xf32>
      %32 = arith.mulf %30, %31 : vector<32x128xf32>
      %cst_23 = arith.constant dense<0.000000e+00> : vector<128xf32>
      %33 = vector.multi_reduction <add>, %32, %cst_23 [0] : vector<32x128xf32> to vector<128xf32>
      %34 = vector.shape_cast %33 : vector<128xf32> to vector<1x128xf32>
      %c0_24 = arith.constant 0 : index
      %c0_25 = arith.constant 0 : index
      %35 = vector.load %arg6[%c0_24, %c0_25] : memref<1x128xf32, #tpu.memory_space<vmem>>, vector<1x128xf32>
      tpu.vector_store %arg6[%c0_24, %c0_25], %34 {strides = array<i32>} : memref<1x128xf32, #tpu.memory_space<vmem>>, vector<1x128xf32>,
    } else {
    }
    return
  }
  func.func @transform_0(%arg0: i32, %arg1: i32) -> (i32, i32) {
    %c0_i32 = arith.constant 0 : i32
    %c0_i32_0 = arith.constant 0 : i32
    return %c0_i32, %arg0 : i32, i32
  }
  func.func @transform_1(%arg0: i32, %arg1: i32) -> (i32, i32) {
    %c0_i32 = arith.constant 0 : i32
    %c0_i32_0 = arith.constant 0 : i32
    return %c0_i32, %arg0 : i32, i32
  }
  func.func @transform_2(%arg0: i32, %arg1: i32) -> (i32, i32) {
    %c0_i32 = arith.constant 0 : i32
    %c0_i32_0 = arith.constant 0 : i32
    return %c0_i32, %arg1 : i32, i32
  }
  func.func @transform_3(%arg0: i32, %arg1: i32) -> (i32, i32) {
    %c0_i32 = arith.constant 0 : i32
    %c0_i32_0 = arith.constant 0 : i32
    return %c0_i32, %arg1 : i32, i32
  }
  func.func @transform_4(%arg0: i32, %arg1: i32) -> (i32, i32) {
    %c0_i32 = arith.constant 0 : i32
    %c0_i32_0 = arith.constant 0 : i32
    return %c0_i32, %arg0 : i32, i32
  }
}

</mosaic_0001>

<bundles_post_ra>
// kernel: genevector_forward.1
= control target key start
LH: loop header
LB: loop body
LE: loop exit
PB: predicated region body
PF: predicated region fallthrough
CT: control target
= control target key end

     0   :  { %v30_v0 = vlaneseq  ;;  %v382_v8 = vmov 1.0   ;;  %s560_s0 = inlined_call_operand.vmem [shape: s32[1,128], index: 0, kind: input, shape index: {}]   ;;  %s561_s1 = inlined_call_operand.vmem [shape: s32[1,128], index: 1, kind: input, shape index: {}]   ;;  %s562_s2 = inlined_call_operand.vmem [shape: f32[32,128], index: 2, kind: input, shape index: {}]   ;;  %s563_s3 = inlined_call_operand.vmem [shape: f32[32,128], index: 3, kind: input, shape index: {}]   ;;  %s564_s4 = inlined_call_operand.vmem [shape: f32[1,128], index: 4, kind: output, shape index: {}]  }
   0x1   :  { %v413_v2 = vld [vmem:[%s560_s0] ss:$0 sm:$0xff]  ;;  %v170_v21 = vld [vmem:[%s562_s2 + $0x10] sm:$0xff]  ;;  %v169_v24 = vld [vmem:[%s562_s2 + $0x8] sm:$0xff] }
   0x2   :  { %v408_v1 = vshrl.u32 %v30_v0, 7  ;;  %v418_v3 = vld [vmem:[%s561_s1] ss:$0 sm:$0xff]  ;;  %v215_v23 = vld [vmem:[%s563_s3 + $0x10] sm:$0xff]  ;;  %v171_v25 = vld [vmem:[%s562_s2 + $0x18] sm:$0xff] }
   0x3   :  { %v168_v20 = vld [vmem:[%s562_s2] sm:$0xff]  ;;  %v214_v26 = vld [vmem:[%s563_s3 + $0x8] sm:$0xff]  ;;  %v216_v27 = vld [vmem:[%s563_s3 + $0x18] sm:$0xff] }
   0x4   :  { %v46_v4 = vadd.s32 120, %v408_v1  ;;  %v45_v5 = vadd.s32 112, %v408_v1  ;;  %v44_v6 = vadd.s32 104, %v408_v1  ;;  %v43_v7 = vadd.s32 96, %v408_v1  ;;  %v213_v22 = vld [vmem:[%s563_s3] sm:$0xff] }
   0x5   :  { %v42_v9 = vadd.s32 88, %v408_v1  ;;  %v41_v10 = vadd.s32 80, %v408_v1  ;;  %v40_v11 = vadd.s32 72, %v408_v1  ;;  %v39_v12 = vadd.s32 64, %v408_v1 }
   0x6   :  { %vm81_vm0 = vcmp.eq.s32.totalorder %v46_v4, %v413_v2  ;;  %vm131_vm1 = vcmp.eq.s32.totalorder %v46_v4, %v418_v3  ;;  %vm80_vm2 = vcmp.eq.s32.totalorder %v45_v5, %v413_v2  ;;  %vm130_vm3 = vcmp.eq.s32.totalorder %v45_v5, %v418_v3 }
   0x7   :  { %315 = vmatpush.msk.msra.mxu0 %vm81_vm0, %v382_v8  ;;  %347 = vmatpush.msk.msra.mxu2 %vm81_vm0, %v382_v8  ;;  %vm79_vm4 = vcmp.eq.s32.totalorder %v44_v6, %v413_v2  ;;  %vm129_vm5 = vcmp.eq.s32.totalorder %v44_v6, %v418_v3  ;;  %vm78_vm6 = vcmp.eq.s32.totalorder %v43_v7, %v413_v2  ;;  %v38_v13 = vadd.s32 56, %v408_v1 }
   0x8   :  { %331 = vmatpush.msk.msra.mxu1 %vm131_vm1, %v382_v8  ;;  %363 = vmatpush.msk.msra.mxu3 %vm131_vm1, %v382_v8  ;;  %vm128_vm7 = vcmp.eq.s32.totalorder %v43_v7, %v418_v3  ;;  %vm77_vm8 = vcmp.eq.s32.totalorder %v42_v9, %v413_v2  ;;  %vm127_vm9 = vcmp.eq.s32.totalorder %v42_v9, %v418_v3  ;;  %v37_v14 = vadd.s32 48, %v408_v1 }
   0x9   :  { %316 = vmatpush.msk.msra.mxu0 %vm80_vm2, %v382_v8  ;;  %348 = vmatpush.msk.msra.mxu2 %vm80_vm2, %v382_v8  ;;  %vm76_vm10 = vcmp.eq.s32.totalorder %v41_v10, %v413_v2  ;;  %vm126_vm11 = vcmp.eq.s32.totalorder %v41_v10, %v418_v3  ;;  %vm75_vm12 = vcmp.eq.s32.totalorder %v40_v11, %v413_v2  ;;  %v36_v15 = vadd.s32 40, %v408_v1 }
   0xa   :  { %332 = vmatpush.msk.msra.mxu1 %vm130_vm3, %v382_v8  ;;  %364 = vmatpush.msk.msra.mxu3 %vm130_vm3, %v382_v8  ;;  %vm125_vm13 = vcmp.eq.s32.totalorder %v40_v11, %v418_v3  ;;  %vm74_vm14 = vcmp.eq.s32.totalorder %v39_v12, %v413_v2  ;;  %vm124_vm15 = vcmp.eq.s32.totalorder %v39_v12, %v418_v3  ;;  %v35_v16 = vadd.s32 32, %v408_v1 }
   0xb   :  { %317 = vmatpush.msk.msra.mxu0 %vm79_vm4, %v382_v8  ;;  %349 = vmatpush.msk.msra.mxu2 %vm79_vm4, %v382_v8  ;;  %vm73_vm0 = vcmp.eq.s32.totalorder %v38_v13, %v413_v2  ;;  %vm123_vm1 = vcmp.eq.s32.totalorder %v38_v13, %v418_v3  ;;  %vm72_vm2 = vcmp.eq.s32.totalorder %v37_v14, %v413_v2  ;;  %v34_v17 = vadd.s32 24, %v408_v1 }
   0xc   :  { %333 = vmatpush.msk.msra.mxu1 %vm129_vm5, %v382_v8  ;;  %365 = vmatpush.msk.msra.mxu3 %vm129_vm5, %v382_v8  ;;  %vm122_vm3 = vcmp.eq.s32.totalorder %v37_v14, %v418_v3  ;;  %vm71_vm4 = vcmp.eq.s32.totalorder %v36_v15, %v413_v2  ;;  %vm121_vm5 = vcmp.eq.s32.totalorder %v36_v15, %v418_v3  ;;  %v33_v18 = vadd.s32 16, %v408_v1 }
   0xd   :  { %318 = vmatpush.msk.msra.mxu0 %vm78_vm6, %v382_v8  ;;  %350 = vmatpush.msk.msra.mxu2 %vm78_vm6, %v382_v8  ;;  %vm70_vm6 = vcmp.eq.s32.totalorder %v35_v16, %v413_v2  ;;  %v32_v19 = vadd.s32 8, %v408_v1 }
   0xe   :  { %334 = vmatpush.msk.msra.mxu1 %vm128_vm7, %v382_v8  ;;  %366 = vmatpush.msk.msra.mxu3 %vm128_vm7, %v382_v8  ;;  %vm120_vm7 = vcmp.eq.s32.totalorder %v35_v16, %v418_v3 }
   0xf   :  { %319 = vmatpush.msk.msra.mxu0 %vm77_vm8, %v382_v8  ;;  %351 = vmatpush.msk.msra.mxu2 %vm77_vm8, %v382_v8  ;;  %vm69_vm8 = vcmp.eq.s32.totalorder %v34_v17, %v413_v2 }
  0x10   :  { %335 = vmatpush.msk.msra.mxu1 %vm127_vm9, %v382_v8  ;;  %367 = vmatpush.msk.msra.mxu3 %vm127_vm9, %v382_v8  ;;  %vm119_vm9 = vcmp.eq.s32.totalorder %v34_v17, %v418_v3 }
  0x11   :  { %320 = vmatpush.msk.msra.mxu0 %vm76_vm10, %v382_v8  ;;  %352 = vmatpush.msk.msra.mxu2 %vm76_vm10, %v382_v8  ;;  %vm68_vm10 = vcmp.eq.s32.totalorder %v33_v18, %v413_v2 }
  0x12   :  { %336 = vmatpush.msk.msra.mxu1 %vm126_vm11, %v382_v8  ;;  %368 = vmatpush.msk.msra.mxu3 %vm126_vm11, %v382_v8  ;;  %vm118_vm11 = vcmp.eq.s32.totalorder %v33_v18, %v418_v3 }
  0x13   :  { %321 = vmatpush.msk.msra.mxu0 %vm75_vm12, %v382_v8  ;;  %353 = vmatpush.msk.msra.mxu2 %vm75_vm12, %v382_v8  ;;  %vm67_vm12 = vcmp.eq.s32.totalorder %v32_v19, %v413_v2 }
  0x14   :  { %337 = vmatpush.msk.msra.mxu1 %vm125_vm13, %v382_v8  ;;  %369 = vmatpush.msk.msra.mxu3 %vm125_vm13, %v382_v8  ;;  %vm117_vm13 = vcmp.eq.s32.totalorder %v32_v19, %v418_v3 }
  0x15   :  { %322 = vmatpush.msk.msra.mxu0 %vm74_vm14, %v382_v8  ;;  %354 = vmatpush.msk.msra.mxu2 %vm74_vm14, %v382_v8  ;;  %vm66_vm14 = vcmp.eq.s32.totalorder %v408_v1, %v413_v2 }
  0x16   :  { %338 = vmatpush.msk.msra.mxu1 %vm124_vm15, %v382_v8  ;;  %370 = vmatpush.msk.msra.mxu3 %vm124_vm15, %v382_v8  ;;  %vm116_vm15 = vcmp.eq.s32.totalorder %v408_v1, %v418_v3 }
  0x17   :  { %323 = vmatpush.msk.msra.mxu0 %vm73_vm0, %v382_v8  ;;  %355 = vmatpush.msk.msra.mxu2 %vm73_vm0, %v382_v8 }
  0x18   :  { %339 = vmatpush.msk.msra.mxu1 %vm123_vm1, %v382_v8  ;;  %371 = vmatpush.msk.msra.mxu3 %vm123_vm1, %v382_v8 }
  0x19   :  { %324 = vmatpush.msk.msra.mxu0 %vm72_vm2, %v382_v8  ;;  %356 = vmatpush.msk.msra.mxu2 %vm72_vm2, %v382_v8 }
  0x1a   :  { %340 = vmatpush.msk.msra.mxu1 %vm122_vm3, %v382_v8  ;;  %372 = vmatpush.msk.msra.mxu3 %vm122_vm3, %v382_v8 }
  0x1b   :  { %325 = vmatpush.msk.msra.mxu0 %vm71_vm4, %v382_v8  ;;  %357 = vmatpush.msk.msra.mxu2 %vm71_vm4, %v382_v8 }
  0x1c   :  { %341 = vmatpush.msk.msra.mxu1 %vm121_vm5, %v382_v8  ;;  %373 = vmatpush.msk.msra.mxu3 %vm121_vm5, %v382_v8 }
  0x1d   :  { %326 = vmatpush.msk.msra.mxu0 %vm70_vm6, %v382_v8  ;;  %358 = vmatpush.msk.msra.mxu2 %vm70_vm6, %v382_v8 }
  0x1e   :  { %342 = vmatpush.msk.msra.mxu1 %vm120_vm7, %v382_v8  ;;  %374 = vmatpush.msk.msra.mxu3 %vm120_vm7, %v382_v8 }
  0x1f   :  { %327 = vmatpush.msk.msra.mxu0 %vm69_vm8, %v382_v8  ;;  %359 = vmatpush.msk.msra.mxu2 %vm69_vm8, %v382_v8 }
  0x20   :  { %343 = vmatpush.msk.msra.mxu1 %vm119_vm9, %v382_v8  ;;  %375 = vmatpush.msk.msra.mxu3 %vm119_vm9, %v382_v8 }
  0x21   :  { %328 = vmatpush.msk.msra.mxu0 %vm68_vm10, %v382_v8  ;;  %360 = vmatpush.msk.msra.mxu2 %vm68_vm10, %v382_v8 }
  0x22   :  { %344 = vmatpush.msk.msra.mxu1 %vm118_vm11, %v382_v8  ;;  %376 = vmatpush.msk.msra.mxu3 %vm118_vm11, %v382_v8 }
  0x23   :  { %329 = vmatpush.msk.msra.mxu0 %vm67_vm12, %v382_v8  ;;  %361 = vmatpush.msk.msra.mxu2 %vm67_vm12, %v382_v8 }
  0x24   :  { %345 = vmatpush.msk.msra.mxu1 %vm117_vm13, %v382_v8  ;;  %377 = vmatpush.msk.msra.mxu3 %vm117_vm13, %v382_v8 }
  0x25   :  { %330 = vmatpush.msk.msra.mxu0 %vm66_vm14, %v382_v8  ;;  %362 = vmatpush.msk.msra.mxu2 %vm66_vm14, %v382_v8 }
  0x26   :  { %346 = vmatpush.msk.msra.mxu1 %vm116_vm15, %v382_v8  ;;  %378 = vmatpush.msk.msra.mxu3 %vm116_vm15, %v382_v8 }
  0x27   :  { %188 = vmatmul.f32.vlgmr.msra.gmra.mxu0 %v168_v20  ;;  %194 = vmatmul.f32.vlgmr.msra.gmra.mxu2 %v170_v21 }
  0x28   :  { %233 = vmatmul.f32.vlgmr.msra.gmra.mxu1 %v213_v22  ;;  %239 = vmatmul.f32.vlgmr.msra.gmra.mxu3 %v215_v23 }
  0x2f   :  { %191 = vmatmul.f32.gmra.mxu0 %v169_v24  ;;  %197 = vmatmul.f32.gmra.mxu2 %v171_v25 }
  0x30   :  { %236 = vmatmul.f32.gmra.mxu1 %v214_v26  ;;  %242 = vmatmul.f32.gmra.mxu3 %v216_v27 }
  0xa4   :  { %v189_v28 = vpop.f32.mrf.mxu0 }
  0xa5   :  { %v234_v29 = vpop.f32.mrf.mxu1 }
  0xa6   :  { %v265_v34 = vmul.f32 %v234_v29, %v189_v28 }
  0xaa   :  { %v195_v30 = vpop.f32.mrf.mxu2 }
  0xab   :  { %v240_v31 = vpop.f32.mrf.mxu3 }
  0xac   :  { %v192_v32 = vpop.f32.mrf.mxu0  ;;  %v267_v37 = vmul.f32 %v240_v31, %v195_v30 }
  0xad   :  { %v237_v33 = vpop.f32.mrf.mxu1 }
  0xae   :  { %v266_v35 = vmul.f32 %v237_v33, %v192_v32 }
  0xb0   :  { %v269_v36 = vadd.f32 %v266_v35, %v265_v34 }
  0xb2   :  { %v198_v38 = vpop.f32.mrf.mxu2  ;;  %v270_v41 = vadd.f32 %v269_v36, %v267_v37 }
  0xb3   :  { %v243_v39 = vpop.f32.mrf.mxu3 }
  0xb4   :  { %v268_v40 = vmul.f32 %v243_v39, %v198_v38 }
  0xb6   :  { %v271_v42 = vadd.f32 %v270_v41, %v268_v40 }
  0xb8   :  { %v272_v43 = vrot.slane %v271_v42, 4 }
  0xba   :  { %v273_v44 = vadd.f32 %v272_v43, %v271_v42 }
  0xbc   :  { %v274_v45 = vrot.slane %v273_v44, 2 }
  0xbe   :  { %v275_v46 = vadd.f32 %v274_v45, %v273_v44 }
  0xc0   :  { %v276_v47 = vrot.slane %v275_v46, 1 }
  0xc2   :  { %v277_v48 = vadd.f32 %v276_v47, %v275_v46 }
  0xc4   :  { %278 = vst [vmem:[%s564_s4] sm:$0x1] %v277_v48 }

</bundles_post_ra>
